<compile_context>
chip_gen: v6e
topology: v6e:2x2x1
jax: 0.10.0
libtpu: 0.0.40
codegen_flags: <defaults>
</compile_context>

<pallas_src>
import functools

import jax
import jax.numpy as jnp
from jax import lax
from jax.experimental import pallas as pl
from jax.experimental.pallas import tpu as pltpu

_LANES = 128               # vreg lane width
_DEFAULT_BLOCK_ROWS = 1024  # sublane rows per grid step (tunable, 512-2048)


def _round_up(x, m):
    return ((x + m - 1) // m) * m


def _n2v_loss_kernel(seed_ref, pred_ref, tgt_ref, loss_ref, num_acc, den_acc,
                     *, thresh, total, block_rows):
    i = pl.program_id(0)
    nsteps = pl.num_programs(0)

    # init vector accumulators on the first grid step
    @pl.when(i == 0)
    def _():
        num_acc[...] = jnp.zeros_like(num_acc)
        den_acc[...] = jnp.zeros_like(den_acc)

    p = pred_ref[...].astype(jnp.float32)
    t = tgt_ref[...].astype(jnp.float32)
    diff = p - t
    sq = diff * diff

    # flat element index of every position in this block
    row = lax.broadcasted_iota(jnp.int32, (block_rows, _LANES), 0)
    lane = lax.broadcasted_iota(jnp.int32, (block_rows, _LANES), 1)
    flat = (i * block_rows + row) * _LANES + lane

    # Stateless hash of (seed, flat index) -> uniform uint32; compare against a
    # precomputed threshold (no u32->f32 conversion on the VALU path).
    x = flat.astype(jnp.uint32) + seed_ref[0].astype(jnp.uint32) * jnp.uint32(0x9E3779B1)
    x = x ^ (x >> jnp.uint32(16))
    x = x * jnp.uint32(0x7FEB352D)
    x = x ^ (x >> jnp.uint32(15))
    x = x * jnp.uint32(0x846CA68B)
    x = x ^ (x >> jnp.uint32(16))
    bern = x < jnp.uint32(thresh)

    def accumulate(keep):
        num_c = jnp.where(keep, sq, jnp.float32(0.0))
        den_c = keep.astype(jnp.float32)
        # reduce (block_rows, 128) -> (8, 128): pure vreg adds on the VPU
        num_acc[...] += num_c.reshape(block_rows // 8, 8, _LANES).sum(axis=0)
        den_acc[...] += den_c.reshape(block_rows // 8, 8, _LANES).sum(axis=0)

    block_end = (i + 1) * (block_rows * _LANES)
    is_full = block_end <= total

    # interior blocks: no tail-validity masking needed
    @pl.when(is_full)
    def _():
        accumulate(bern)

    # last (partial) block: exclude padded / out-of-bounds elements
    @pl.when(jnp.logical_not(is_full))
    def _():
        accumulate(jnp.logical_and(bern, flat < total))

    # finalize: single cross-lane reduce + epsilon divide
    @pl.when(i == nsteps - 1)
    def _():
        num = jnp.sum(num_acc[...])
        den = jnp.sum(den_acc[...])
        loss_ref[...] = (num / (den + jnp.float32(1e-6))).reshape(1, 1)


def noise2void_loss(prediction, target, *, mask_ratio=0.1, seed=0,
                    block_rows=_DEFAULT_BLOCK_ROWS):
    """Pallas TPU implementation of Noise2VoidLoss.forward."""
    assert prediction.shape == target.shape, "prediction/target shape mismatch"
    total = int(prediction.size)

    p = jnp.ravel(prediction)
    t = jnp.ravel(target)

    # tiny tail pad (< 128 elements) only when needed to form full lanes
    rem = (-total) % _LANES
    if rem:
        p = jnp.pad(p, (0, rem))
        t = jnp.pad(t, (0, rem))
    rows = (total + rem) // _LANES
    p2 = p.reshape(rows, _LANES)
    t2 = t.reshape(rows, _LANES)

    # clamp the tile to the data size; keep it a multiple of 16 sublanes
    br = max(16, min(int(block_rows), _round_up(rows, 16)))
    br = _round_up(br, 16)
    grid = (pl.cdiv(rows, br),)

    # Bernoulli threshold in uint32 space (computed at trace time)
    thresh = min(max(int(round(float(mask_ratio) * (1 << 32))), 0), (1 << 32) - 1)

    seed_arr = jnp.array([seed], dtype=jnp.int32)
    kernel = functools.partial(_n2v_loss_kernel,
                               thresh=thresh, total=total, block_rows=br)

    bytes_in = total * (prediction.dtype.itemsize + target.dtype.itemsize)
    cost = pl.CostEstimate(flops=12 * total, transcendentals=0,
                           bytes_accessed=bytes_in + 4)

    loss = pl.pallas_call(
        kernel,
        out_shape=jax.ShapeDtypeStruct((1, 1), jnp.float32),
        grid_spec=pltpu.PrefetchScalarGridSpec(
            num_scalar_prefetch=1,                     # seed lands in SMEM
            grid=grid,
            in_specs=[
                pl.BlockSpec((br, _LANES), lambda i, seed: (i, 0)),
                pl.BlockSpec((br, _LANES), lambda i, seed: (i, 0)),
            ],
            out_specs=pl.BlockSpec((1, 1), lambda i, seed: (0, 0)),
            scratch_shapes=[pltpu.VMEM((8, _LANES), jnp.float32),   # masked-loss partials
                            pltpu.VMEM((8, _LANES), jnp.float32)],  # mask-count partials
        ),
        compiler_params=pltpu.CompilerParams(
            dimension_semantics=("arbitrary",)),       # sequential reduction
        cost_estimate=cost,
    )(seed_arr, p2, t2)
    return loss[0, 0]


if __name__ == "__main__":
    key = jax.random.PRNGKey(0)
    k1, k2 = jax.random.split(key)
    prediction = jax.random.normal(k1, (2, 4, 16, 16), dtype=jnp.float32)
    target = jax.random.normal(k2, (2, 4, 16, 16), dtype=jnp.float32)

    loss = noise2void_loss(prediction, target, mask_ratio=0.1, seed=0)
    loss = jax.block_until_ready(loss)

    assert loss.shape == () and loss.dtype == jnp.float32
    assert bool(jnp.isfinite(loss))
    print("KERNEL_OK")
</pallas_src>

<mosaic_0001>
module attributes {stable_mosaic.version = 11 : i64} {
  func.func @_n2v_loss_kernel(%arg0: i32, %arg1: memref<1xi32, #tpu.memory_space<smem>>, %arg2: memref<16x128xf32, #tpu.memory_space<vmem>>, %arg3: memref<16x128xf32, #tpu.memory_space<vmem>>, %arg4: memref<1x1xf32, #tpu.memory_space<vmem>>, %arg5: memref<8x128xf32, #tpu.memory_space<vmem>>, %arg6: memref<8x128xf32, #tpu.memory_space<vmem>>) attributes {dimension_semantics = [#tpu.dimension_semantics<arbitrary>], iteration_bounds = array<i64: 1>, scalar_prefetch = 1 : i64, scratch_operands = 2 : i64, tpu.core_type = #tpu.core_type<tc>, window_params = [{transform_indices = @transform_0, window_bounds = array<i64: 16, 128>}, {transform_indices = @transform_1, window_bounds = array<i64: 16, 128>}, {pipeline_mode = #tpu.pipeline_mode<synchronous>, transform_indices = @transform_2, window_bounds = array<i64: 1, 1>}]} {
    %c0_i32 = arith.constant 0 : i32
    %0 = arith.cmpi eq, %arg0, %c0_i32 : i32
    %1 = arith.extui %0 : i1 to i32
    %c0_i32_0 = arith.constant 0 : i32
    %2 = arith.cmpi ne, %1, %c0_i32_0 : i32
    scf.if %2 {
      %cst = arith.constant 0.000000e+00 : f32
      %45 = vector.broadcast %cst : f32 to vector<8x128xf32>
      %c0_12 = arith.constant 0 : index
      %c0_13 = arith.constant 0 : index
      %46 = vector.load %arg5[%c0_12, %c0_13] : memref<8x128xf32, #tpu.memory_space<vmem>>, vector<8x128xf32>
      tpu.vector_store %arg5[%c0_12, %c0_13], %45 {strides = array<i32>} : memref<8x128xf32, #tpu.memory_space<vmem>>, vector<8x128xf32>,
      %cst_14 = arith.constant 0.000000e+00 : f32
      %47 = vector.broadcast %cst_14 : f32 to vector<8x128xf32>
      %c0_15 = arith.constant 0 : index
      %c0_16 = arith.constant 0 : index
      %48 = vector.load %arg6[%c0_15, %c0_16] : memref<8x128xf32, #tpu.memory_space<vmem>>, vector<8x128xf32>
      tpu.vector_store %arg6[%c0_15, %c0_16], %47 {strides = array<i32>} : memref<8x128xf32, #tpu.memory_space<vmem>>, vector<8x128xf32>,
    } else {
    }
    %c0 = arith.constant 0 : index
    %c0_1 = arith.constant 0 : index
    %3 = vector.load %arg2[%c0, %c0_1] : memref<16x128xf32, #tpu.memory_space<vmem>>, vector<16x128xf32>
    %c0_2 = arith.constant 0 : index
    %c0_3 = arith.constant 0 : index
    %4 = vector.load %arg3[%c0_2, %c0_3] : memref<16x128xf32, #tpu.memory_space<vmem>>, vector<16x128xf32>
    %5 = arith.subf %3, %4 : vector<16x128xf32>
    %6 = arith.mulf %5, %5 : vector<16x128xf32>
    %7 = tpu.iota {dimensions = array<i32: 0>} : vector<16x128xi32>
    %8 = tpu.iota {dimensions = array<i32: 1>} : vector<16x128xi32>
    %c16_i32 = arith.constant 16 : i32
    %9 = arith.muli %arg0, %c16_i32 : i32
    %10 = vector.broadcast %9 : i32 to vector<16x128xi32>
    %11 = arith.addi %10, %7 : vector<16x128xi32>
    %c128_i32 = arith.constant 128 : i32
    %12 = vector.broadcast %c128_i32 : i32 to vector<16x128xi32>
    %13 = arith.muli %11, %12 : vector<16x128xi32>
    %14 = arith.addi %13, %8 : vector<16x128xi32>
    %c0_4 = arith.constant 0 : index
    %15 = memref.load %arg1[%c0_4] : memref<1xi32, #tpu.memory_space<smem>>
    %c-1640531535_i32 = arith.constant -1640531535 : i32
    %16 = arith.muli %15, %c-1640531535_i32 : i32
    %17 = vector.broadcast %16 : i32 to vector<16x128xi32>
    %18 = arith.addi %14, %17 : vector<16x128xi32>
    %c16_i32_5 = arith.constant 16 : i32
    %19 = vector.broadcast %c16_i32_5 : i32 to vector<16x128xi32>
    %20 = arith.shrui %18, %19 : vector<16x128xi32>
    %21 = arith.xori %18, %20 : vector<16x128xi32>
    %c2146121005_i32 = arith.constant 2146121005 : i32
    %22 = vector.broadcast %c2146121005_i32 : i32 to vector<16x128xi32>
    %23 = arith.muli %21, %22 : vector<16x128xi32>
    %c15_i32 = arith.constant 15 : i32
    %24 = vector.broadcast %c15_i32 : i32 to vector<16x128xi32>
    %25 = arith.shrui %23, %24 : vector<16x128xi32>
    %26 = arith.xori %23, %25 : vector<16x128xi32>
    %c-2073254261_i32 = arith.constant -2073254261 : i32
    %27 = vector.broadcast %c-2073254261_i32 : i32 to vector<16x128xi32>
    %28 = arith.muli %26, %27 : vector<16x128xi32>
    %c16_i32_6 = arith.constant 16 : i32
    %29 = vector.broadcast %c16_i32_6 : i32 to vector<16x128xi32>
    %30 = arith.shrui %28, %29 : vector<16x128xi32>
    %31 = arith.xori %28, %30 : vector<16x128xi32>
    %c429496730_i32 = arith.constant 429496730 : i32
    %32 = vector.broadcast %c429496730_i32 : i32 to vector<16x128xi32>
    %33 = arith.cmpi ult, %31, %32 : vector<16x128xi32>
    %c1_i32 = arith.constant 1 : i32
    %34 = arith.addi %arg0, %c1_i32 : i32
    %c2048_i32 = arith.constant 2048 : i32
    %35 = arith.muli %34, %c2048_i32 : i32
    %c2048_i32_7 = arith.constant 2048 : i32
    %36 = arith.cmpi sle, %35, %c2048_i32_7 : i32
    %37 = arith.extui %36 : i1 to i32
    %c0_i32_8 = arith.constant 0 : i32
    %38 = arith.cmpi ne, %37, %c0_i32_8 : i32
    scf.if %38 {
      %cst = arith.constant 0.000000e+00 : f32
      %45 = vector.broadcast %cst : f32 to vector<16x128xf32>
      %46 = arith.select %33, %6, %45 : vector<16x128xi1>, vector<16x128xf32>
      %47 = arith.extui %33 : vector<16x128xi1> to vector<16x128xi32>
      %48 = arith.sitofp %47 : vector<16x128xi32> to vector<16x128xf32>
      %c0_12 = arith.constant 0 : index
      %c0_13 = arith.constant 0 : index
      %49 = vector.load %arg5[%c0_12, %c0_13] : memref<8x128xf32, #tpu.memory_space<vmem>>, vector<8x128xf32>
      %50 = vector.shape_cast %46 : vector<16x128xf32> to vector<2x8x128xf32>
      %cst_14 = arith.constant dense<0.000000e+00> : vector<8x128xf32>
      %51 = vector.multi_reduction <add>, %50, %cst_14 [0] : vector<2x8x128xf32> to vector<8x128xf32>
      %52 = arith.addf %49, %51 : vector<8x128xf32>
      %c0_15 = arith.constant 0 : index
      %c0_16 = arith.constant 0 : index
      %53 = vector.load %arg5[%c0_15, %c0_16] : memref<8x128xf32, #tpu.memory_space<vmem>>, vector<8x128xf32>
      tpu.vector_store %arg5[%c0_15, %c0_16], %52 {strides = array<i32>} : memref<8x128xf32, #tpu.memory_space<vmem>>, vector<8x128xf32>,
      %c0_17 = arith.constant 0 : index
      %c0_18 = arith.constant 0 : index
      %54 = vector.load %arg6[%c0_17, %c0_18] : memref<8x128xf32, #tpu.memory_space<vmem>>, vector<8x128xf32>
      %55 = vector.shape_cast %48 : vector<16x128xf32> to vector<2x8x128xf32>
      %cst_19 = arith.constant dense<0.000000e+00> : vector<8x128xf32>
      %56 = vector.multi_reduction <add>, %55, %cst_19 [0] : vector<2x8x128xf32> to vector<8x128xf32>
      %57 = arith.addf %54, %56 : vector<8x128xf32>
      %c0_20 = arith.constant 0 : index
      %c0_21 = arith.constant 0 : index
      %58 = vector.load %arg6[%c0_20, %c0_21] : memref<8x128xf32, #tpu.memory_space<vmem>>, vector<8x128xf32>
      tpu.vector_store %arg6[%c0_20, %c0_21], %57 {strides = array<i32>} : memref<8x128xf32, #tpu.memory_space<vmem>>, vector<8x128xf32>,
    } else {
    }
    %true = arith.constant true
    %39 = arith.xori %36, %true : i1
    %40 = arith.extui %39 : i1 to i32
    %c0_i32_9 = arith.constant 0 : i32
    %41 = arith.cmpi ne, %40, %c0_i32_9 : i32
    scf.if %41 {
      %c2048_i32_12 = arith.constant 2048 : i32
      %45 = vector.broadcast %c2048_i32_12 : i32 to vector<16x128xi32>
      %46 = arith.cmpi slt, %14, %45 : vector<16x128xi32>
      %47 = arith.andi %33, %46 : vector<16x128xi1>
      %cst = arith.constant 0.000000e+00 : f32
      %48 = vector.broadcast %cst : f32 to vector<16x128xf32>
      %49 = arith.select %47, %6, %48 : vector<16x128xi1>, vector<16x128xf32>
      %50 = arith.extui %47 : vector<16x128xi1> to vector<16x128xi32>
      %51 = arith.sitofp %50 : vector<16x128xi32> to vector<16x128xf32>
      %c0_13 = arith.constant 0 : index
      %c0_14 = arith.constant 0 : index
      %52 = vector.load %arg5[%c0_13, %c0_14] : memref<8x128xf32, #tpu.memory_space<vmem>>, vector<8x128xf32>
      %53 = vector.shape_cast %49 : vector<16x128xf32> to vector<2x8x128xf32>
      %cst_15 = arith.constant dense<0.000000e+00> : vector<8x128xf32>
      %54 = vector.multi_reduction <add>, %53, %cst_15 [0] : vector<2x8x128xf32> to vector<8x128xf32>
      %55 = arith.addf %52, %54 : vector<8x128xf32>
      %c0_16 = arith.constant 0 : index
      %c0_17 = arith.constant 0 : index
      %56 = vector.load %arg5[%c0_16, %c0_17] : memref<8x128xf32, #tpu.memory_space<vmem>>, vector<8x128xf32>
      tpu.vector_store %arg5[%c0_16, %c0_17], %55 {strides = array<i32>} : memref<8x128xf32, #tpu.memory_space<vmem>>, vector<8x128xf32>,
      %c0_18 = arith.constant 0 : index
      %c0_19 = arith.constant 0 : index
      %57 = vector.load %arg6[%c0_18, %c0_19] : memref<8x128xf32, #tpu.memory_space<vmem>>, vector<8x128xf32>
      %58 = vector.shape_cast %51 : vector<16x128xf32> to vector<2x8x128xf32>
      %cst_20 = arith.constant dense<0.000000e+00> : vector<8x128xf32>
      %59 = vector.multi_reduction <add>, %58, %cst_20 [0] : vector<2x8x128xf32> to vector<8x128xf32>
      %60 = arith.addf %57, %59 : vector<8x128xf32>
      %c0_21 = arith.constant 0 : index
      %c0_22 = arith.constant 0 : index
      %61 = vector.load %arg6[%c0_21, %c0_22] : memref<8x128xf32, #tpu.memory_space<vmem>>, vector<8x128xf32>
      tpu.vector_store %arg6[%c0_21, %c0_22], %60 {strides = array<i32>} : memref<8x128xf32, #tpu.memory_space<vmem>>, vector<8x128xf32>,
    } else {
    }
    %c0_i32_10 = arith.constant 0 : i32
    %42 = arith.cmpi eq, %arg0, %c0_i32_10 : i32
    %43 = arith.extui %42 : i1 to i32
    %c0_i32_11 = arith.constant 0 : i32
    %44 = arith.cmpi ne, %43, %c0_i32_11 : i32
    scf.if %44 {
      %c0_12 = arith.constant 0 : index
      %c0_13 = arith.constant 0 : index
      %45 = vector.load %arg5[%c0_12, %c0_13] : memref<8x128xf32, #tpu.memory_space<vmem>>, vector<8x128xf32>
      %46 = vector.shape_cast %45 : vector<8x128xf32> to vector<1x8x128xf32>
      %cst = arith.constant dense<0.000000e+00> : vector<1xf32>
      %47 = vector.multi_reduction <add>, %46, %cst [1, 2] : vector<1x8x128xf32> to vector<1xf32>
      %48 = vector.shape_cast %47 : vector<1xf32> to vector<1x1x1xf32>
      %49 = vector.extract %48[0, 0, 0] : f32 from vector<1x1x1xf32>
      %c0_14 = arith.constant 0 : index
      %c0_15 = arith.constant 0 : index
      %50 = vector.load %arg6[%c0_14, %c0_15] : memref<8x128xf32, #tpu.memory_space<vmem>>, vector<8x128xf32>
      %51 = vector.shape_cast %50 : vector<8x128xf32> to vector<1x8x128xf32>
      %cst_16 = arith.constant dense<0.000000e+00> : vector<1xf32>
      %52 = vector.multi_reduction <add>, %51, %cst_16 [1, 2] : vector<1x8x128xf32> to vector<1xf32>
      %53 = vector.shape_cast %52 : vector<1xf32> to vector<1x1x1xf32>
      %54 = vector.extract %53[0, 0, 0] : f32 from vector<1x1x1xf32>
      %cst_17 = arith.constant 9.99999997E-7 : f32
      %55 = arith.addf %54, %cst_17 : f32
      %56 = arith.divf %49, %55 : f32
      %57 = vector.broadcast %56 : f32 to vector<1x1xf32>
      %c0_18 = arith.constant 0 : index
      %c0_19 = arith.constant 0 : index
      %58 = vector.load %arg4[%c0_18, %c0_19] : memref<1x1xf32, #tpu.memory_space<vmem>>, vector<1x1xf32>
      tpu.vector_store %arg4[%c0_18, %c0_19], %57 {strides = array<i32>} : memref<1x1xf32, #tpu.memory_space<vmem>>, vector<1x1xf32>,
    } else {
    }
    return
  }
  func.func @transform_0(%arg0: i32, %arg1: memref<1xi32, #tpu.memory_space<smem>>) -> (i32, i32) {
    %c0_i32 = arith.constant 0 : i32
    %c0_i32_0 = arith.constant 0 : i32
    return %arg0, %c0_i32 : i32, i32
  }
  func.func @transform_1(%arg0: i32, %arg1: memref<1xi32, #tpu.memory_space<smem>>) -> (i32, i32) {
    %c0_i32 = arith.constant 0 : i32
    %c0_i32_0 = arith.constant 0 : i32
    return %arg0, %c0_i32 : i32, i32
  }
  func.func @transform_2(%arg0: i32, %arg1: memref<1xi32, #tpu.memory_space<smem>>) -> (i32, i32) {
    %c0_i32 = arith.constant 0 : i32
    %c0_i32_0 = arith.constant 0 : i32
    %c0_i32_1 = arith.constant 0 : i32
    return %c0_i32, %c0_i32_0 : i32, i32
  }
}

</mosaic_0001>

<bundles_post_ra>
// kernel: tpu_custom_call.1
= control target key start
LH: loop header
LB: loop body
LE: loop exit
PB: predicated region body
PF: predicated region fallthrough
CT: control target
= control target key end

     0   :  { %9 = vsyncpa [#allocation7], 0  ;;  %s303_s0 = inlined_call_operand.<no memory space> [shape: s32[1], index: 0, kind: input, shape index: {}]   ;;  %s304_s1 = inlined_call_operand.hbm [shape: f32[16,128], index: 1, kind: input, shape index: {}]   ;;  %s305_s2 = inlined_call_operand.hbm [shape: f32[16,128], index: 2, kind: input, shape index: {}]   ;;  %s306_s3 = inlined_call_operand.hbm [shape: f32[1,1], index: 3, kind: output, shape index: {}]  }
   0x1   :  { %10 = vsyncpa [#allocation10], 0 }
   0x2   :  { %11 = vsyncpa [#allocation8], 0  ;;  %s265_s12 = smov [#allocation6]  }
   0x3   :  { %s17_s13 = sshll.u32 %s265_s12, 4  ;;  %s18_s13 = int_to_ptr.vmem [resolvable:$true] %s17_s13 }
   0x4   :  { %s207_s14 = scalar_lea.vmem %s18_s13, 256  ;;  %p212_p1 = scmp.lt.s32.totalorder %s18_s13, %s18_s13 }
   0x5   :  { %p208_p0 = scmp.ne.s32.totalorder %s18_s13, %s207_s14  ;;  %p213_p2 = scmp.lt.s32.totalorder %s207_s14, %s207_s14 }
   0x7   :  { %p214_p3 = por %p213_p2, %p212_p1 }
   0x9   :  { %p215_p4 = pnand %p214_p3, %p208_p0 }
   0xb   :  { %218 = shalt.err (!%p215_p4)
}
   0xc   :  { %s266_s15 = smov 128   ;;  %s267_s16 = smov 8  }
   0xd   :  { %23 = dma.hbm_to_vmem [thread:$0]  %s304_s1, 256, %s18_s13, [#allocation7], %s266_s15, %s266_s15, %s267_s16  }
   0xe   :  { %s268_s19 = smov [#allocation9]  }
   0xf   :  { %s29_s20 = sshll.u32 %s268_s19, 4  ;;  %s30_s20 = int_to_ptr.vmem [resolvable:$true] %s29_s20 }
  0x10   :  { %s227_s21 = scalar_lea.vmem %s30_s20, 256  ;;  %p232_p6 = scmp.lt.s32.totalorder %s30_s20, %s30_s20 }
  0x11   :  { %p228_p5 = scmp.ne.s32.totalorder %s30_s20, %s227_s21  ;;  %p233_p7 = scmp.lt.s32.totalorder %s227_s21, %s227_s21 }
  0x13   :  { %p234_p8 = por %p233_p7, %p232_p6 }
  0x15   :  { %p235_p9 = pnand %p234_p8, %p228_p5 }
  0x17   :  { %238 = shalt.err (!%p235_p9)
}
  0x18   :  { %35 = dma.hbm_to_vmem [thread:$0]  %s305_s2, 256, %s30_s20, [#allocation10], %s266_s15, %s266_s15, %s267_s16  }
  0x19   :  { %259 = dma.done.wait [#allocation7], 256  }
  0x1a   :  { %260 = vsyncadd [#allocation7], 4294967040 }
  0x1b   :  { %261 = dma.done.wait [#allocation10], 256  }
  0x1c   :  { %262 = vsyncadd [#allocation10], 4294967040  ;;  %v56_v0 = vlaneseq  ;;  %s70_s25 = smul.u32 2654435761, %s303_s0  ;;  %v48_v16 = vld [vmem:[#allocation6] sm:$0xff]  ;;  %v50_v17 = vld [vmem:[#allocation9] sm:$0xff] }
  0x1d   :  { %v49_v20 = vld [vmem:[#allocation6 + $0x8] sm:$0xff]  ;;  %v51_v21 = vld [vmem:[#allocation9 + $0x8] sm:$0xff]  ;;  %v52_v24 = vsub.f32 %v48_v16, %v50_v17  ;;  %v269_v37 = vmov 0.0   ;;  %s270_s27 = smov [#allocation11]   ;;  %vm163_vm2 = vcmask 0  }
  0x1e   :  { %v57_v1 = vshrl.u32 %v56_v0, 7  ;;  %v60_v2 = vand.u32 127, %v56_v0  ;;  %v71_v5 = vstv %s70_s25  ;;  %v53_v27 = vsub.f32 %v49_v20, %v51_v21  ;;  %s171_s28 = sshll.u32 %s270_s27, 4  ;;  %s172_s28 = int_to_ptr.vmem [resolvable:$true] %s171_s28 }
  0x1f   :  { %v54_v30 = vmul.f32 %v52_v24, %v52_v24  ;;  %s239_s4 = scalar_lea.vmem %s172_s28, 16  ;;  %s243_s5 = scalar_lea.vmem %s172_s28, 32 }
  0x20   :  { %v58_v3 = vadd.s32 8, %v57_v1  ;;  %v65_v4 = vmul.u32 128, %v57_v1  ;;  %v55_v33 = vmul.f32 %v53_v27, %v53_v27  ;;  %p240_p10 = scmp.ne.s32.totalorder %s172_s28, %s239_s4  ;;  %p244_p11 = scmp.lt.s32.totalorder %s172_s28, %s172_s28 }
  0x21   :  { %p245_p12 = scmp.lt.s32.totalorder %s243_s5, %s239_s4 }
  0x22   :  { %v66_v6 = vmul.u32 128, %v58_v3  ;;  %v67_v7 = vadd.s32 %v65_v4, %v60_v2 }
  0x23   :  { %p246_p13 = por %p245_p12, %p244_p11 }
  0x24   :  { %v68_v8 = vadd.s32 %v66_v6, %v60_v2  ;;  %v72_v9 = vadd.s32 %v71_v5, %v67_v7 }
  0x25   :  { %p247_p0 = pnand %p246_p13, %p240_p10 }
  0x26   :  { %v73_v10 = vadd.s32 %v71_v5, %v68_v8  ;;  %v74_v11 = vshrl.u32 %v72_v9, 16 }
  0x28   :  { %v75_v12 = vshrl.u32 %v73_v10, 16  ;;  %v76_v13 = vxor.u32 %v74_v11, %v72_v9 }
  0x2a   :  { %v77_v14 = vxor.u32 %v75_v12, %v73_v10  ;;  %v78_v15 = vmul.u32 2146121005, %v76_v13 }
  0x2c   :  { %v79_v18 = vmul.u32 2146121005, %v77_v14  ;;  %v80_v19 = vshrl.u32 %v78_v15, 15 }
  0x2e   :  { %v81_v22 = vshrl.u32 %v79_v18, 15  ;;  %v82_v23 = vxor.u32 %v80_v19, %v78_v15 }
  0x30   :  { %v83_v25 = vxor.u32 %v81_v22, %v79_v18  ;;  %v84_v26 = vmul.u32 2221713035, %v82_v23 }
  0x32   :  { %v85_v28 = vmul.u32 2221713035, %v83_v25  ;;  %v86_v29 = vshrl.u32 %v84_v26, 16 }
  0x34   :  { %v87_v31 = vshrl.u32 %v85_v28, 16  ;;  %v88_v32 = vxor.u32 %v86_v29, %v84_v26 }
  0x36   :  { %v89_v34 = vxor.u32 %v87_v31, %v85_v28  ;;  %vm90_vm0 = vcmp.lt.u32.totalorder %v88_v32, 429496730 }
  0x37   :  { %v98_v35 = vsel %vm90_vm0, %v54_v30, 0.0  ;;  %v181_v38 = vsel %vm90_vm0, 1.0, %v269_v37 }
  0x38   :  { %vm91_vm1 = vcmp.lt.u32.totalorder %v89_v34, 429496730 }
  0x39   :  { %v99_v36 = vsel %vm91_vm1, %v55_v33, 0.0  ;;  %v182_v39 = vsel %vm91_vm1, 1.0, %v269_v37 }
  0x3a   :  { %v105_v40 = vadd.f32 %v99_v36, %v98_v35  ;;  %v109_v41 = vadd.f32 %v182_v39, %v181_v38 }
  0x3c   :  { %138 = vadd.xlane.f32.xlu0 %v105_v40 }
  0x40   :  { %148 = vadd.xlane.f32.xlu0 %v109_v41 }
  0xc5   :  { %v139_v42 = vpop.xlane.xlu0 %138 }
  0xc6   :  { %v140_v43 = vrot.slane %v139_v42, 4 }
  0xc8   :  { %v141_v44 = vadd.f32 %v140_v43, %v139_v42 }
  0xc9   :  { %v149_v45 = vpop.xlane.xlu0 %148 }
  0xca   :  { %v142_v46 = vrot.slane %v141_v44, 2  ;;  %v150_v47 = vrot.slane %v149_v45, 4 }
  0xcc   :  { %v151_v48 = vadd.f32 %v150_v47, %v149_v45  ;;  %v143_v49 = vadd.f32 %v142_v46, %v141_v44 }
  0xce   :  { %v152_v50 = vrot.slane %v151_v48, 2  ;;  %v144_v51 = vrot.slane %v143_v49, 1 }
  0xd0   :  { %v153_v52 = vadd.f32 %v152_v50, %v151_v48  ;;  %v145_v53 = vadd.f32 %v144_v51, %v143_v49 }
  0xd2   :  { %185 = vpush %v145_v53  ;;  %v154_v54 = vrot.slane %v153_v52, 1 }
  0xd4   :  { %v155_v55 = vadd.f32 %v154_v54, %v153_v52 }
  0xd6   :  { %187 = vpush %v155_v55 }
 0x103   :  { %s186_s0 = spop %185 }
 0x107   :  { %s188_s2 = spop %187 }
 0x108   :  { %s157_s26 = sadd.f32 1e-06, %s188_s2 }
 0x10a   :  { %v158_v56 = vstv %s157_s26 }
 0x10b   :  { %197 = vrcp.f32 %v158_v56 }
 0x118   :  { %v198_v57 = vpop.eup %197 }
 0x119   :  { %189 = vpush %v198_v57 }
 0x14a   :  { %s190_s29 = spop %189 }
 0x14b   :  { %s161_s30 = smul.f32 %s190_s29, %s186_s0 }
 0x14d   :  { %v162_v58 = vstv %s161_s30 }
 0x14e   :  { %164 = vst.msk [vmem:[#allocation11] sm:$0x1] %vm163_vm2, %v162_v58 }
 0x14f   :  { %250 = shalt.err (!%p247_p0)
}
 0x150   :  { %174 = dma.vmem_to_hbm [thread:$0]  %s172_s28, 16, %s306_s3, [#allocation8]  }
 0x151   :  { %263 = dma.done.wait [#allocation8], 16  }
 0x152   :  { %264 = vsyncadd [#allocation8], 4294967280 }
 0x153   :  { %178 = vsyncpa [#allocation7], 1 }
 0x154   :  { %179 = vsyncpa [#allocation10], 1 }
 0x155   :  { %180 = vsyncpa [#allocation8], 1 }

</bundles_post_ra>
